<compile_context>
chip_gen: v5e
topology: v5e:2x2
jax: 0.10.0
libtpu: 0.0.40
codegen_flags: <defaults>
</compile_context>

<pallas_src>
import functools
from typing import NamedTuple

import jax
import jax.numpy as jnp
from jax.experimental import pallas as pl
from jax.experimental.pallas import tpu as pltpu


def _round_up(x, m):
    return ((x + m - 1) // m) * m


def _cdiv(a, b):
    return -(-a // b)


# --------------------------------------------------------------------------
# Kernel
# --------------------------------------------------------------------------
def ffn_kernel(x_ref, w1_ref, b1_ref, w2_ref, b2_ref, o_ref, acc_ref, *,
               precision):
    h_idx = pl.program_id(1)

    @pl.when(h_idx == 0)
    def _():
        acc_ref[...] = jnp.zeros_like(acc_ref)

    # linear1 (partial over hidden tile): [TB, I_p] @ [I_p, TH] + b1 tile
    h = jnp.dot(x_ref[...], w1_ref[...],
                preferred_element_type=jnp.float32, precision=precision)
    h = h + b1_ref[...]
    # LeakyReLU (PyTorch default negative_slope = 0.01): single VPU max.
    h = jnp.maximum(h, 0.01 * h)
    # linear2 partial accumulate: [TB, TH] @ [TH, O_p]
    acc_ref[...] += jnp.dot(h.astype(w2_ref.dtype), w2_ref[...],
                            preferred_element_type=jnp.float32,
                            precision=precision)

    @pl.when(h_idx == pl.num_programs(1) - 1)
    def _():
        o_ref[...] = (acc_ref[...] + b2_ref[...]).astype(o_ref.dtype)


# --------------------------------------------------------------------------
# Parameter preparation (padding / casting done ONCE, not per call)
# --------------------------------------------------------------------------
class FFNParams(NamedTuple):
    w1: jax.Array          # [I_p, H_p], compute dtype
    b1: jax.Array          # [1, H_p],  float32
    w2: jax.Array          # [H_p, O_p], compute dtype
    b2: jax.Array          # [1, O_p],  float32
    input_size: int
    output_size: int
    hidden_tile: int       # TH (divides H_p)
    precision: jax.lax.Precision


def _choose_hidden_tile(I_p, H, O_p, tb_est, itemsize, budget, lane_multiple):
    """Pick the hidden-dim tile TH (and padded H) so weights fit the VMEM budget."""
    H_full = _round_up(H, lane_multiple)
    # VMEM that does not depend on TH: streamed x/out (double-buffered),
    # f32 accumulator scratch, resident b2 block.
    fixed = (2 * tb_est * I_p * itemsize + 2 * tb_est * O_p * 4
             + tb_est * O_p * 4 + 8 * O_p * 4)

    def w_bytes(th, nbuf):
        # w1 slab + w2 slab (+ 8-sublane-padded b1 slab).
        return nbuf * th * ((I_p + O_p) * itemsize + 8 * 4)

    if fixed + w_bytes(H_full, 1) <= budget:
        return H_full, H_full          # whole hidden dim resident, single-buffered

    th = lane_multiple
    while th * 2 < H_full and fixed + w_bytes(th * 2, 2) <= budget:
        th *= 2
    return th, _round_up(H, th)


def prepare_ffn_params(w1, b1, w2, b2, *, compute_dtype=jnp.float32,
                       lane_multiple=128, batch_tile=256,
                       vmem_budget_bytes=48 << 20):
    """Pad weights to lane-dense shapes and cast to the compute dtype.

    lane_multiple=256 can help compute-bound shapes on v6e/v7x (256x256 MXU);
    128 is always safe. bfloat16 compute_dtype is recommended for performance;
    float32 uses Precision.HIGHEST so it matches nn.Linear exactly.
    """
    I, H = w1.shape
    O = w2.shape[1]
    itemsize = jnp.dtype(compute_dtype).itemsize

    I_p = _round_up(I, lane_multiple)
    O_p = _round_up(O, lane_multiple)
    TH, H_p = _choose_hidden_tile(I_p, H, O_p, min(batch_tile, 512), itemsize,
                                  vmem_budget_bytes, lane_multiple)

    # Zero padding is exact: padded hidden lanes get bias 0 -> LeakyReLU(0)=0
    # -> contribute 0 through zero-padded w2 rows.
    w1_p = jnp.zeros((I_p, H_p), compute_dtype).at[:I, :H].set(
        w1.astype(compute_dtype))
    b1_p = jnp.zeros((1, H_p), jnp.float32).at[0, :H].set(b1.astype(jnp.float32))
    w2_p = jnp.zeros((H_p, O_p), compute_dtype).at[:H, :O].set(
        w2.astype(compute_dtype))
    b2_p = jnp.zeros((1, O_p), jnp.float32).at[0, :O].set(b2.astype(jnp.float32))

    precision = (jax.lax.Precision.HIGHEST
                 if jnp.dtype(compute_dtype) == jnp.dtype(jnp.float32)
                 else jax.lax.Precision.DEFAULT)

    return FFNParams(w1_p, b1_p, w2_p, b2_p, I, O, TH, precision)


# --------------------------------------------------------------------------
# Forward
# --------------------------------------------------------------------------
def ffn_forward(x, params: FFNParams, *, batch_tile=256,
                vmem_budget_bytes=48 << 20, out_dtype=None):
    """x: [B, input_size] -> [B, output_size]."""
    B, I = x.shape
    assert I == params.input_size, "input feature size mismatch"
    w1_p, b1_p, w2_p, b2_p = params.w1, params.b1, params.w2, params.b2
    I_p, H_p = w1_p.shape
    O_p = w2_p.shape[1]
    O = params.output_size
    TH = params.hidden_tile
    n_h = H_p // TH
    cdt = w1_p.dtype
    cd_size = jnp.dtype(cdt).itemsize
    out_dtype = x.dtype if out_dtype is None else out_dtype
    out_size = jnp.dtype(out_dtype).itemsize

    # ----- batch tiling -----
    B8 = _round_up(B, 8)
    TB = min(batch_tile, B8)
    # v7x megacore: if the batch permits, use >=2 grid steps on the parallel
    # axis so both TensorCores get work.
    if B8 >= 16 and B8 // TB < 2:
        TB = _round_up(_cdiv(B8, 2), 8)

    def _stream_bytes(tb):  # double-buffered x/out + f32 accumulator
        return 2 * tb * I_p * cd_size + 2 * tb * O_p * out_size + tb * O_p * 4

    while TB > 8 and _stream_bytes(TB) > vmem_budget_bytes // 3:
        TB = max(8, TB // 2)
    B_p = _round_up(B, TB)

    # ----- pad/cast x only when needed (static check) -----
    x_c = x.astype(cdt)
    if (B_p, I_p) != (B, I):
        x_p = jnp.zeros((B_p, I_p), cdt).at[:B, :I].set(x_c)
    else:
        x_p = x_c

    grid = (B_p // TB, n_h)

    # Resident (constant index_map) blocks need only a single VMEM buffer;
    # h-tiled weight blocks keep default double-buffering so the next hidden
    # slab prefetches behind the matmuls.
    const_mode = pl.Buffered(1)
    w_mode = const_mode if n_h == 1 else None

    nbuf_w = 1 if n_h == 1 else 2
    vmem_est = (nbuf_w * TH * (I_p + O_p) * cd_size
                + nbuf_w * 8 * TH * 4 + 8 * O_p * 4
                + _stream_bytes(TB))
    vmem_limit = int(min(max(int(vmem_est * 1.3) + (2 << 20), 16 << 20),
                         100 << 20))

    flops = 2 * B_p * (I_p * H_p + H_p * O_p)
    bytes_accessed = (B_p * I_p * cd_size + B_p * O_p * out_size
                      + (I_p * H_p + H_p * O_p) * cd_size + (H_p + O_p) * 4)

    kernel = functools.partial(ffn_kernel, precision=params.precision)

    out_p = pl.pallas_call(
        kernel,
        out_shape=jax.ShapeDtypeStruct((B_p, O_p), out_dtype),
        grid_spec=pltpu.PrefetchScalarGridSpec(
            num_scalar_prefetch=0,
            grid=grid,
            in_specs=[
                # x: tiled over batch, resident across hidden steps
                pl.BlockSpec((TB, I_p), lambda i, h: (i, 0)),
                # w1 / b1 / w2: tiled over hidden (resident when n_h == 1)
                pl.BlockSpec((I_p, TH), lambda i, h: (0, h), pipeline_mode=w_mode),
                pl.BlockSpec((1, TH), lambda i, h: (0, h), pipeline_mode=w_mode),
                pl.BlockSpec((TH, O_p), lambda i, h: (h, 0), pipeline_mode=w_mode),
                # b2: always resident
                pl.BlockSpec((1, O_p), lambda i, h: (0, 0), pipeline_mode=const_mode),
            ],
            out_specs=pl.BlockSpec((TB, O_p), lambda i, h: (i, 0)),
            scratch_shapes=[pltpu.VMEM((TB, O_p), jnp.float32)],
        ),
        compiler_params=pltpu.CompilerParams(
            dimension_semantics=("parallel", "arbitrary"),
            vmem_limit_bytes=vmem_limit),
        cost_estimate=pl.CostEstimate(
            flops=flops, transcendentals=0, bytes_accessed=bytes_accessed),
    )(x_p, w1_p, b1_p, w2_p, b2_p)

    if (B_p, O_p) != (B, O):
        return out_p[:B, :O]
    return out_p


# --------------------------------------------------------------------------
# Init / reference
# --------------------------------------------------------------------------
def init_ffn_params(key, input_size, hidden_size, output_size, dtype=jnp.float32):
    """Mimic nn.Linear default init (uniform +/-1/sqrt(fan_in)), deterministic."""
    k1, k2, k3, k4 = jax.random.split(key, 4)
    bound1 = 1.0 / (input_size ** 0.5)
    bound2 = 1.0 / (hidden_size ** 0.5)
    # Stored already transposed: [in, out]
    w1 = jax.random.uniform(k1, (input_size, hidden_size), dtype, -bound1, bound1)
    b1 = jax.random.uniform(k2, (hidden_size,), dtype, -bound1, bound1)
    w2 = jax.random.uniform(k3, (hidden_size, output_size), dtype, -bound2, bound2)
    b2 = jax.random.uniform(k4, (output_size,), dtype, -bound2, bound2)
    return w1, b1, w2, b2


def ffn_reference(x, w1, b1, w2, b2):
    hp = jax.lax.Precision.HIGHEST
    h = jnp.dot(x, w1, precision=hp) + b1
    h = jnp.where(h > 0, h, 0.01 * h)
    return jnp.dot(h, w2, precision=hp) + b2


# --------------------------------------------------------------------------
# Demo / self-test
# --------------------------------------------------------------------------
if __name__ == "__main__":
    input_size, hidden_size, output_size = 32, 64, 16
    batch = 8

    key = jax.random.PRNGKey(0)
    kx, kp = jax.random.split(key)
    x = jax.random.normal(kx, (batch, input_size), jnp.float32)
    w1, b1, w2, b2 = init_ffn_params(kp, input_size, hidden_size, output_size)

    ref = ffn_reference(x, w1, b1, w2, b2)

    # Exact-f32 path (matches nn.Linear semantics via Precision.HIGHEST).
    params_f32 = prepare_ffn_params(w1, b1, w2, b2, compute_dtype=jnp.float32)
    fwd_f32 = jax.jit(lambda xx: ffn_forward(xx, params_f32))
    out = jax.block_until_ready(fwd_f32(x))
    assert out.shape == (batch, output_size)
    assert jnp.allclose(out, ref, atol=1e-4, rtol=1e-4), "f32 mismatch vs reference"

    # bf16 MXU path (recommended for performance), f32 accumulation.
    params_bf16 = prepare_ffn_params(w1, b1, w2, b2, compute_dtype=jnp.bfloat16)
    fwd_bf16 = jax.jit(lambda xx: ffn_forward(xx, params_bf16))
    out_bf16 = jax.block_until_ready(fwd_bf16(x))
    assert out_bf16.shape == (batch, output_size)
    assert jnp.allclose(out_bf16, ref, atol=5e-2, rtol=5e-2), "bf16 mismatch vs reference"

    print("KERNEL_OK")
</pallas_src>

<mosaic_0001>
module attributes {stable_mosaic.version = 11 : i64} {
  func.func @ffn_kernel(%arg0: i32, %arg1: i32, %arg2: memref<8x128xf32, #tpu.memory_space<vmem>>, %arg3: memref<128x128xf32, #tpu.memory_space<vmem>>, %arg4: memref<1x128xf32, #tpu.memory_space<vmem>>, %arg5: memref<128x128xf32, #tpu.memory_space<vmem>>, %arg6: memref<1x128xf32, #tpu.memory_space<vmem>>, %arg7: memref<8x128xf32, #tpu.memory_space<vmem>>, %arg8: memref<8x128xf32, #tpu.memory_space<vmem>>) attributes {dimension_semantics = [#tpu.dimension_semantics<parallel>, #tpu.dimension_semantics<arbitrary>], iteration_bounds = array<i64: 1, 1>, scalar_prefetch = 0 : i64, scratch_operands = 1 : i64, tpu.core_type = #tpu.core_type<tc>, window_params = [{transform_indices = @transform_0, window_bounds = array<i64: 8, 128>}, {pipeline_mode = #tpu.pipeline_mode<synchronous>, transform_indices = @transform_1, window_bounds = array<i64: 128, 128>}, {pipeline_mode = #tpu.pipeline_mode<synchronous>, transform_indices = @transform_2, window_bounds = array<i64: 1, 128>}, {pipeline_mode = #tpu.pipeline_mode<synchronous>, transform_indices = @transform_3, window_bounds = array<i64: 128, 128>}, {pipeline_mode = #tpu.pipeline_mode<synchronous>, transform_indices = @transform_4, window_bounds = array<i64: 1, 128>}, {transform_indices = @transform_5, window_bounds = array<i64: 8, 128>}]} {
    %c0_i32 = arith.constant 0 : i32
    %0 = arith.cmpi eq, %arg1, %c0_i32 : i32
    %1 = arith.extui %0 : i1 to i32
    %c0_i32_0 = arith.constant 0 : i32
    %2 = arith.cmpi ne, %1, %c0_i32_0 : i32
    scf.if %2 {
      %cst_16 = arith.constant 0.000000e+00 : f32
      %20 = vector.broadcast %cst_16 : f32 to vector<8x128xf32>
      %c0_17 = arith.constant 0 : index
      %c0_18 = arith.constant 0 : index
      %21 = vector.load %arg8[%c0_17, %c0_18] : memref<8x128xf32, #tpu.memory_space<vmem>>, vector<8x128xf32>
      tpu.vector_store %arg8[%c0_17, %c0_18], %20 {strides = array<i32>} : memref<8x128xf32, #tpu.memory_space<vmem>>, vector<8x128xf32>,
    } else {
    }
    %c0 = arith.constant 0 : index
    %c0_1 = arith.constant 0 : index
    %3 = vector.load %arg2[%c0, %c0_1] : memref<8x128xf32, #tpu.memory_space<vmem>>, vector<8x128xf32>
    %c0_2 = arith.constant 0 : index
    %c0_3 = arith.constant 0 : index
    %4 = vector.load %arg3[%c0_2, %c0_3] : memref<128x128xf32, #tpu.memory_space<vmem>>, vector<128x128xf32>
    %cst = arith.constant dense<0.000000e+00> : vector<8x128xf32>
    %5 = tpu.matmul %3, %4, %cst {dimension_numbers = #tpu.dot_dimension_numbers<[1], [0], [0], [1], [0, 0, 1, 1], [], []>, precision = #tpu.contract_precision<fp32>} : vector<8x128xf32>, vector<128x128xf32>, vector<8x128xf32> -> vector<8x128xf32>
    %c0_4 = arith.constant 0 : index
    %c0_5 = arith.constant 0 : index
    %6 = vector.load %arg4[%c0_4, %c0_5] : memref<1x128xf32, #tpu.memory_space<vmem>>, vector<1x128xf32>
    %7 = vector.broadcast %6 : vector<1x128xf32> to vector<8x128xf32>
    %8 = arith.addf %5, %7 : vector<8x128xf32>
    %cst_6 = arith.constant 0.00999999977 : f32
    %9 = vector.broadcast %cst_6 : f32 to vector<8x128xf32>
    %10 = arith.mulf %9, %8 : vector<8x128xf32>
    %11 = arith.maximumf %8, %10 : vector<8x128xf32>
    %c0_7 = arith.constant 0 : index
    %c0_8 = arith.constant 0 : index
    %12 = vector.load %arg8[%c0_7, %c0_8] : memref<8x128xf32, #tpu.memory_space<vmem>>, vector<8x128xf32>
    %c0_9 = arith.constant 0 : index
    %c0_10 = arith.constant 0 : index
    %13 = vector.load %arg5[%c0_9, %c0_10] : memref<128x128xf32, #tpu.memory_space<vmem>>, vector<128x128xf32>
    %cst_11 = arith.constant dense<0.000000e+00> : vector<8x128xf32>
    %14 = tpu.matmul %11, %13, %cst_11 {dimension_numbers = #tpu.dot_dimension_numbers<[1], [0], [0], [1], [0, 0, 1, 1], [], []>, precision = #tpu.contract_precision<fp32>} : vector<8x128xf32>, vector<128x128xf32>, vector<8x128xf32> -> vector<8x128xf32>
    %15 = arith.addf %12, %14 : vector<8x128xf32>
    %c0_12 = arith.constant 0 : index
    %c0_13 = arith.constant 0 : index
    %16 = vector.load %arg8[%c0_12, %c0_13] : memref<8x128xf32, #tpu.memory_space<vmem>>, vector<8x128xf32>
    tpu.vector_store %arg8[%c0_12, %c0_13], %15 {strides = array<i32>} : memref<8x128xf32, #tpu.memory_space<vmem>>, vector<8x128xf32>,
    %c0_i32_14 = arith.constant 0 : i32
    %17 = arith.cmpi eq, %arg1, %c0_i32_14 : i32
    %18 = arith.extui %17 : i1 to i32
    %c0_i32_15 = arith.constant 0 : i32
    %19 = arith.cmpi ne, %18, %c0_i32_15 : i32
    scf.if %19 {
      %c0_16 = arith.constant 0 : index
      %c0_17 = arith.constant 0 : index
      %20 = vector.load %arg8[%c0_16, %c0_17] : memref<8x128xf32, #tpu.memory_space<vmem>>, vector<8x128xf32>
      %c0_18 = arith.constant 0 : index
      %c0_19 = arith.constant 0 : index
      %21 = vector.load %arg6[%c0_18, %c0_19] : memref<1x128xf32, #tpu.memory_space<vmem>>, vector<1x128xf32>
      %22 = vector.broadcast %21 : vector<1x128xf32> to vector<8x128xf32>
      %23 = arith.addf %20, %22 : vector<8x128xf32>
      %c0_20 = arith.constant 0 : index
      %c0_21 = arith.constant 0 : index
      %24 = vector.load %arg7[%c0_20, %c0_21] : memref<8x128xf32, #tpu.memory_space<vmem>>, vector<8x128xf32>
      tpu.vector_store %arg7[%c0_20, %c0_21], %23 {strides = array<i32>} : memref<8x128xf32, #tpu.memory_space<vmem>>, vector<8x128xf32>,
    } else {
    }
    return
  }
  func.func @transform_0(%arg0: i32, %arg1: i32) -> (i32, i32) {
    %c0_i32 = arith.constant 0 : i32
    %c0_i32_0 = arith.constant 0 : i32
    return %arg0, %c0_i32 : i32, i32
  }
  func.func @transform_1(%arg0: i32, %arg1: i32) -> (i32, i32) {
    %c0_i32 = arith.constant 0 : i32
    %c0_i32_0 = arith.constant 0 : i32
    return %c0_i32, %arg1 : i32, i32
  }
  func.func @transform_2(%arg0: i32, %arg1: i32) -> (i32, i32) {
    %c0_i32 = arith.constant 0 : i32
    %c0_i32_0 = arith.constant 0 : i32
    return %c0_i32, %arg1 : i32, i32
  }
  func.func @transform_3(%arg0: i32, %arg1: i32) -> (i32, i32) {
    %c0_i32 = arith.constant 0 : i32
    %c0_i32_0 = arith.constant 0 : i32
    return %arg1, %c0_i32 : i32, i32
  }
  func.func @transform_4(%arg0: i32, %arg1: i32) -> (i32, i32) {
    %c0_i32 = arith.constant 0 : i32
    %c0_i32_0 = arith.constant 0 : i32
    %c0_i32_1 = arith.constant 0 : i32
    return %c0_i32, %c0_i32_0 : i32, i32
  }
  func.func @transform_5(%arg0: i32, %arg1: i32) -> (i32, i32) {
    %c0_i32 = arith.constant 0 : i32
    %c0_i32_0 = arith.constant 0 : i32
    return %arg0, %c0_i32 : i32, i32
  }
}

</mosaic_0001>

<bundles_post_ra>
// kernel: _lambda_.1
= control target key start
LH: loop header
LB: loop body
LE: loop exit
PB: predicated region body
PF: predicated region fallthrough
CT: control target
= control target key end

     0   :  { %10 = vsyncpa [#allocation4], 0  ;;  %s1434_s0 = inlined_call_operand.vmem [shape: f32[8,128], index: 0, kind: input, shape index: {}]   ;;  %s1435_s1 = inlined_call_operand.hbm [shape: f32[128,128], index: 1, kind: input, shape index: {}]   ;;  %s1436_s2 = inlined_call_operand.vmem [shape: f32[1,128], index: 2, kind: input, shape index: {}]   ;;  %s1437_s3 = inlined_call_operand.hbm [shape: f32[128,128], index: 3, kind: input, shape index: {}]   ;;  %s1438_s4 = inlined_call_operand.vmem [shape: f32[1,128], index: 4, kind: input, shape index: {}]   ;;  %s1439_s5 = inlined_call_operand.hbm [shape: f32[8,128], index: 5, kind: output, shape index: {}]  }
   0x1   :  { %11 = vsyncpa [#allocation7], 0 }
   0x2   :  { %12 = vsyncpa [#allocation5], 0  ;;  %s19_s20 = sshll.u32 %s1435_s1, 4  ;;  %s895_s21 = smov [#allocation3]   ;;  %s20_s20 = int_to_ptr.hbm [resolvable:$true] %s19_s20 }
   0x3   :  { %s21_s22 = sshll.u32 %s895_s21, 4  ;;  %s34_s25 = sshll.u32 %s1437_s3, 4  ;;  %s22_s22 = int_to_ptr.vmem [resolvable:$true] %s21_s22  ;;  %s35_s25 = int_to_ptr.hbm [resolvable:$true] %s34_s25 }
   0x4   :  { %s896_s26 = smov 128   ;;  %s897_s27 = smov 8  }
   0x5   :  { %27 = dma.hbm_to_vmem [thread:$0]  %s20_s20, 2048, %s22_s22, [#allocation4], %s896_s26, %s896_s26, %s897_s27  }
   0x6   :  { %s898_s28 = smov [#allocation6]  }
   0x7   :  { %s36_s29 = sshll.u32 %s898_s28, 4  ;;  %s37_s29 = int_to_ptr.vmem [resolvable:$true] %s36_s29 }
   0x8   :  { %42 = dma.hbm_to_vmem [thread:$0]  %s35_s25, 2048, %s37_s29, [#allocation7], %s896_s26, %s896_s26, %s897_s27  }
   0x9   :  { %889 = dma.done.wait [#allocation4], 2048  }
   0xa   :  { %890 = vsyncadd [#allocation4], 4294965248 }
   0xb   :  { %891 = dma.done.wait [#allocation7], 2048  }
   0xc   :  { %892 = vsyncadd [#allocation7], 4294965248  ;;  %v74_v0 = vld [vmem:[#allocation3 + $0x78] sm:$0xff]  ;;  %v73_v1 = vld [vmem:[#allocation3 + $0x70] sm:$0xff]  ;;  %s899_s7 = smov [#allocation8]   ;;  %s799_s11 = sshll.u32 %s1439_s5, 4  ;;  %s800_s11 = int_to_ptr.hbm [resolvable:$true] %s799_s11 }
   0xd   :  { %v72_v2 = vld [vmem:[#allocation3 + $0x68] sm:$0xff]  ;;  %v936_v3 = vand.u32 4294901760, %v74_v0  ;;  %v938_v4 = vand.u32 4294901760, %v73_v1  ;;  %v71_v6 = vld [vmem:[#allocation3 + $0x60] sm:$0xff]  ;;  %v70_v7 = vld [vmem:[#allocation3 + $0x58] sm:$0xff]  ;;  %s797_s8 = sshll.u32 %s899_s7, 4  ;;  %s798_s8 = int_to_ptr.vmem [resolvable:$true] %s797_s8 }
   0xe   :  { %v940_v5 = vand.u32 4294901760, %v72_v2  ;;  %v69_v8 = vld [vmem:[#allocation3 + $0x50] sm:$0xff]  ;;  %v942_v9 = vand.u32 4294901760, %v71_v6  ;;  %v944_v10 = vand.u32 4294901760, %v70_v7  ;;  %v68_v12 = vld [vmem:[#allocation3 + $0x48] sm:$0xff]  ;;  %v67_v13 = vld [vmem:[#allocation3 + $0x40] sm:$0xff] }
   0xf   :  { %v946_v11 = vand.u32 4294901760, %v69_v8  ;;  %80 = vmatpush.msra.mxu0 %v936_v3  ;;  %v950_v14 = vsub.f32 %v74_v0, %v936_v3  ;;  %v953_v15 = vsub.f32 %v73_v1, %v938_v4  ;;  %v958_v17 = vand.u32 4294901760, %v68_v12  ;;  %276 = vmatpush.msra.mxu3 %v936_v3  ;;  %v66_v21 = vld [vmem:[#allocation3 + $0x38] sm:$0xff]  ;;  %v65_v34 = vld [vmem:[#allocation3 + $0x30] sm:$0xff]  ;;  %v64_v35 = vld [vmem:[#allocation3 + $0x28] sm:$0xff] }
  0x10   :  { %v956_v16 = vsub.f32 %v72_v2, %v940_v5  ;;  %v962_v18 = vsub.f32 %v71_v6, %v942_v9  ;;  %v965_v19 = vsub.f32 %v70_v7, %v944_v10  ;;  %v967_v20 = vand.u32 4294901760, %v67_v13  ;;  %v63_v42 = vld [vmem:[#allocation3 + $0x20] sm:$0xff]  ;;  %v62_v47 = vld [vmem:[#allocation3 + $0x18] sm:$0xff]  ;;  %v61_v53 = vld [vmem:[#allocation3 + $0x10] sm:$0xff] }
  0x11   :  { %82 = vmatpush.msra.mxu0 %v938_v4  ;;  %v122_v22 = vand.u32 4294901760, %v950_v14  ;;  %v128_v23 = vand.u32 4294901760, %v953_v15  ;;  %v974_v25 = vsub.f32 %v69_v8, %v946_v11  ;;  %223 = vmatpush.msra.mxu2 %v950_v14  ;;  %v980_v28 = vsub.f32 %v68_v12, %v958_v17  ;;  %v60_v61 = vld [vmem:[#allocation3 + $0x8] sm:$0xff]  ;;  %v59_v2 = vld [vmem:[#allocation3] sm:$0xff] }
  0x12   :  { %v134_v24 = vand.u32 4294901760, %v956_v16  ;;  %v140_v26 = vand.u32 4294901760, %v962_v18  ;;  %v146_v27 = vand.u32 4294901760, %v965_v19  ;;  %278 = vmatpush.msra.mxu3 %v938_v4  ;;  %v993_v32 = vand.u32 4294901760, %v66_v21 }
  0x13   :  { %v123_v29 = vsub.f32 %v950_v14, %v122_v22  ;;  %84 = vmatpush.msra.mxu0 %v940_v5  ;;  %v129_v30 = vsub.f32 %v953_v15, %v128_v23  ;;  %226 = vmatpush.msra.mxu2 %v953_v15  ;;  %v997_v33 = vsub.f32 %v67_v13, %v967_v20  ;;  %v152_v39 = vand.u32 4294901760, %v974_v25  ;;  %v438_v14 = vld [vmem:[#allocation6 + $0x78] sm:$0xff] }
  0x14   :  { %v135_v31 = vsub.f32 %v956_v16, %v134_v24  ;;  %280 = vmatpush.msra.mxu3 %v940_v5  ;;  %v141_v38 = vsub.f32 %v962_v18, %v140_v26  ;;  %v147_v40 = vsub.f32 %v965_v19, %v146_v27  ;;  %v158_v41 = vand.u32 4294901760, %v980_v28 }
  0x15   :  { %v124_v36 = vand.u32 4294901760, %v123_v29  ;;  %v130_v37 = vand.u32 4294901760, %v129_v30  ;;  %86 = vmatpush.msra.mxu0 %v942_v9  ;;  %229 = vmatpush.msra.mxu2 %v956_v16  ;;  %v1012_v44 = vand.u32 4294901760, %v65_v34  ;;  %v1015_v45 = vsub.f32 %v66_v21, %v993_v32  ;;  %v58_v29 = vld [vmem:[%s1434_s0] sm:$0xff] }
  0x16   :  { %282 = vmatpush.msra.mxu3 %v942_v9  ;;  %v136_v43 = vand.u32 4294901760, %v135_v31  ;;  %v1017_v46 = vand.u32 4294901760, %v64_v35  ;;  %v164_v48 = vand.u32 4294901760, %v997_v33  ;;  %v142_v49 = vand.u32 4294901760, %v141_v38 }
  0x17   :  { %125 = vmatpush.msra.mxu1 %v124_v36  ;;  %88 = vmatpush.msra.mxu0 %v944_v10  ;;  %v153_v50 = vsub.f32 %v974_v25, %v152_v39  ;;  %v1027_v51 = vsub.f32 %v65_v34, %v1012_v44  ;;  %v1029_v52 = vand.u32 4294901760, %v63_v42  ;;  %v1031_v54 = vand.u32 4294901760, %v62_v47 }
  0x18   :  { %232 = vmatpush.msra.mxu2 %v962_v18  ;;  %284 = vmatpush.msra.mxu3 %v944_v10  ;;  %v148_v55 = vand.u32 4294901760, %v147_v40  ;;  %v159_v56 = vsub.f32 %v980_v28, %v158_v41  ;;  %v170_v57 = vand.u32 4294901760, %v1015_v45  ;;  %v1041_v58 = vsub.f32 %v64_v35, %v1017_v46 }
  0x19   :  { %131 = vmatpush.msra.mxu1 %v130_v37  ;;  %90 = vmatpush.msra.mxu0 %v946_v11  ;;  %v165_v59 = vsub.f32 %v997_v33, %v164_v48  ;;  %v1046_v60 = vand.u32 4294901760, %v61_v53  ;;  %v154_v62 = vand.u32 4294901760, %v153_v50  ;;  %v176_v63 = vand.u32 4294901760, %v1027_v51 }
  0x1a   :  { %235 = vmatpush.msra.mxu2 %v965_v19  ;;  %286 = vmatpush.msra.mxu3 %v946_v11  ;;  %v1053_v0 = vsub.f32 %v63_v42, %v1029_v52  ;;  %v1056_v1 = vsub.f32 %v62_v47, %v1031_v54  ;;  %v160_v6 = vand.u32 4294901760, %v159_v56  ;;  %v171_v7 = vsub.f32 %v1015_v45, %v170_v57  ;;  %v431_v19 = vld [vmem:[#allocation6 + $0x40] sm:$0xff] }
  0x1b   :  { %137 = vmatpush.msra.mxu1 %v136_v43  ;;  %92 = vmatpush.msra.mxu0 %v958_v17  ;;  %v182_v8 = vand.u32 4294901760, %v1041_v58  ;;  %v1065_v12 = vand.u32 4294901760, %v60_v61  ;;  %v166_v13 = vand.u32 4294901760, %v165_v59  ;;  %v1068_v21 = vsub.f32 %v61_v53, %v1046_v60 }
  0x1c   :  { %238 = vmatpush.msra.mxu2 %v974_v25  ;;  %288 = vmatpush.msra.mxu3 %v958_v17  ;;  %v177_v30 = vsub.f32 %v1027_v51, %v176_v63  ;;  %v188_v31 = vand.u32 4294901760, %v1053_v0  ;;  %v1080_v34 = vand.u32 4294901760, %v59_v2  ;;  %v1082_v35 = vand.u32 4294901760, %v58_v29 }
  0x1d   :  { %143 = vmatpush.msra.mxu1 %v142_v49  ;;  %94 = vmatpush.msra.mxu0 %v967_v20  ;;  %v194_v36 = vand.u32 4294901760, %v1056_v1  ;;  %v172_v37 = vand.u32 4294901760, %v171_v7  ;;  %v183_v38 = vsub.f32 %v1041_v58, %v182_v8  ;;  %v1092_v40 = vsub.f32 %v60_v61, %v1065_v12 }
  0x1e   :  { %241 = vmatpush.msra.mxu2 %v980_v28  ;;  %290 = vmatpush.msra.mxu3 %v967_v20  ;;  %v112_v42 = vsub.f32 %v58_v29, %v1082_v35  ;;  %v178_v43 = vand.u32 4294901760, %v177_v30  ;;  %v189_v47 = vsub.f32 %v1053_v0, %v188_v31  ;;  %v200_v49 = vand.u32 4294901760, %v1068_v21 }
  0x1f   :  { %149 = vmatpush.msra.mxu1 %v148_v55  ;;  %96 = vmatpush.msra.mxu0 %v993_v32  ;;  %v1103_v50 = vsub.f32 %v59_v2, %v1080_v34  ;;  %v184_v53 = vand.u32 4294901760, %v183_v38  ;;  %v195_v55 = vsub.f32 %v1056_v1, %v194_v36  ;;  %v206_v56 = vand.u32 4294901760, %v1092_v40 }
  0x20   :  { %244 = vmatpush.msra.mxu2 %v997_v33  ;;  %292 = vmatpush.msra.mxu3 %v993_v32  ;;  %v113_v59 = vand.u32 4294901760, %v112_v42  ;;  %v190_v61 = vand.u32 4294901760, %v189_v47  ;;  %v436_v47 = vld [vmem:[#allocation6 + $0x68] sm:$0xff]  ;;  %v1145_v15 = vand.u32 4294901760, %v438_v14  ;;  %v430_v33 = vld [vmem:[#allocation6 + $0x38] sm:$0xff] }
  0x21   :  { %155 = vmatpush.msra.mxu1 %v154_v62  ;;  %98 = vmatpush.msra.mxu0 %v1012_v44  ;;  %v201_v62 = vsub.f32 %v1068_v21, %v200_v49  ;;  %v212_v2 = vand.u32 4294901760, %v1103_v50  ;;  %v207_v7 = vsub.f32 %v1092_v40, %v206_v56  ;;  %v1149_v16 = vand.u32 4294901760, %v436_v47 }
  0x22   :  { %247 = vmatpush.msra.mxu2 %v1015_v45  ;;  %294 = vmatpush.msra.mxu3 %v1012_v44  ;;  %v1224_v45 = vand.u32 4294901760, %v430_v33 }
  0x23   :  { %161 = vmatpush.msra.mxu1 %v160_v6  ;;  %100 = vmatpush.msra.mxu0 %v1017_v46  ;;  %v196_v6 = vand.u32 4294901760, %v195_v55  ;;  %v202_v29 = vand.u32 4294901760, %v201_v62  ;;  %v213_v30 = vsub.f32 %v1103_v50, %v212_v2 }
  0x24   :  { %250 = vmatpush.msra.mxu2 %v1027_v51  ;;  %296 = vmatpush.msra.mxu3 %v1017_v46  ;;  %v1239_v51 = vsub.f32 %v430_v33, %v1224_v45 }
  0x25   :  { %167 = vmatpush.msra.mxu1 %v166_v13  ;;  %102 = vmatpush.msra.mxu0 %v1029_v52  ;;  %v114_v13 = vsub.f32 %v112_v42, %v113_v59 }
  0x26   :  { %253 = vmatpush.msra.mxu2 %v1041_v58  ;;  %298 = vmatpush.msra.mxu3 %v1029_v52 }
  0x27   :  { %173 = vmatpush.msra.mxu1 %v172_v37  ;;  %104 = vmatpush.msra.mxu0 %v1031_v54  ;;  %v208_v37 = vand.u32 4294901760, %v207_v7  ;;  %v115_v38 = vand.u32 4294901760, %v114_v13  ;;  %v1185_v13 = vand.u32 4294901760, %v431_v19 }
  0x28   :  { %256 = vmatpush.msra.mxu2 %v1053_v0  ;;  %300 = vmatpush.msra.mxu3 %v1031_v54  ;;  %v424_v0 = vld [vmem:[#allocation6 + $0x8] sm:$0xff] }
  0x29   :  { %179 = vmatpush.msra.mxu1 %v178_v43  ;;  %106 = vmatpush.msra.mxu0 %v1046_v60  ;;  %v214_v43 = vand.u32 4294901760, %v213_v30 }
  0x2a   :  { %259 = vmatpush.msra.mxu2 %v1056_v1  ;;  %302 = vmatpush.msra.mxu3 %v1046_v60  ;;  %v423_v1 = vld [vmem:[#allocation6] sm:$0xff] }
  0x2b   :  { %185 = vmatpush.msra.mxu1 %v184_v53  ;;  %108 = vmatpush.msra.mxu0 %v1065_v12  ;;  %v433_v53 = vld [vmem:[#allocation6 + $0x50] sm:$0xff] }
  0x2c   :  { %262 = vmatpush.msra.mxu2 %v1068_v21  ;;  %304 = vmatpush.msra.mxu3 %v1065_v12  ;;  %v1156_v55 = vand.u32 4294901760, %v433_v53 }
  0x2d   :  { %191 = vmatpush.msra.mxu1 %v190_v61  ;;  %110 = vmatpush.msra.mxu0 %v1080_v34  ;;  %v1168_v61 = vsub.f32 %v436_v47, %v1149_v16 }
  0x2e   :  { %265 = vmatpush.msra.mxu2 %v1092_v40  ;;  %306 = vmatpush.msra.mxu3 %v1080_v34  ;;  %v1190_v30 = vsub.f32 %v433_v53, %v1156_v55 }
  0x2f   :  { %317 = vmatpush.msrb.mxu0 %v122_v22  ;;  %197 = vmatpush.msra.mxu1 %v196_v6  ;;  %v437_v22 = vld [vmem:[#allocation6 + $0x70] sm:$0xff]  ;;  %v494_v7 = vand.u32 4294901760, %v1168_v61 }
  0x30   :  { %268 = vmatpush.msra.mxu2 %v1103_v50  ;;  %310 = vmatmul.f32.vlgmr.msra.gmra.mxu3 %v113_v59 }
  0x31   :  { %321 = vmatpush.msrb.mxu0 %v128_v23  ;;  %203 = vmatpush.msra.mxu1 %v202_v29  ;;  %v1147_v23 = vand.u32 4294901760, %v437_v22 }
  0x32   :  { %271 = vmatmul.f32.vlgmr.msra.gmra.mxu2 %v112_v42  ;;  %116 = vmatmul.f32.vlgmr.msra.gmra.mxu0 %v115_v38  ;;  %v434_v42 = vld [vmem:[#allocation6 + $0x58] sm:$0xff] }
  0x33   :  { %325 = vmatpush.msrb.mxu0 %v134_v24  ;;  %209 = vmatpush.msra.mxu1 %v208_v37  ;;  %v435_v24 = vld [vmem:[#allocation6 + $0x60] sm:$0xff]  ;;  %v1165_v59 = vsub.f32 %v437_v22, %v1147_v23  ;;  %v495_v37 = vsub.f32 %v1168_v61, %v494_v7 }
  0x34   :  { %v1152_v18 = vand.u32 4294901760, %v435_v24  ;;  %440 = vmatpush.msrb.mxu2 %v1145_v15 }
  0x35   :  { %329 = vmatpush.msrb.mxu0 %v140_v26  ;;  %215 = vmatpush.msra.mxu1 %v214_v43  ;;  %v1154_v26 = vand.u32 4294901760, %v434_v42  ;;  %v1213_v43 = vsub.f32 %v431_v19, %v1185_v13  ;;  %v496_v53 = vand.u32 4294901760, %v495_v37 }
  0x36   :  { %217 = vmatmul.f32.vlgmr.msra.gmra.mxu1 %v1082_v35  ;;  %v1173_v6 = vsub.f32 %v435_v24, %v1152_v18  ;;  %442 = vmatpush.msrb.mxu2 %v1147_v23  ;;  %v512_v24 = vand.u32 4294901760, %v1190_v30 }
  0x37   :  { %384 = vmatpush.msrb.mxu1 %v936_v3  ;;  %333 = vmatpush.msrb.mxu0 %v146_v27  ;;  %v432_v3 = vld [vmem:[#allocation6 + $0x48] sm:$0xff]  ;;  %v1162_v27 = vsub.f32 %v438_v14, %v1145_v15 }
  0x38   :  { %v1170_v62 = vand.u32 4294901760, %v432_v3  ;;  %v500_v29 = vand.u32 4294901760, %v1173_v6  ;;  %444 = vmatpush.msrb.mxu2 %v1149_v16  ;;  %v428_v14 = vld [vmem:[#allocation6 + $0x28] sm:$0xff] }
  0x39   :  { %386 = vmatpush.msrb.mxu1 %v938_v4  ;;  %337 = vmatpush.msrb.mxu0 %v152_v39  ;;  %v1177_v4 = vsub.f32 %v434_v42, %v1154_v26  ;;  %v482_v25 = vand.u32 4294901760, %v1162_v27  ;;  %v488_v39 = vand.u32 4294901760, %v1165_v59  ;;  %v427_v42 = vld [vmem:[#allocation6 + $0x20] sm:$0xff]  ;;  %v1232_v19 = vand.u32 4294901760, %v428_v14 }
  0x3a   :  { %v501_v47 = vsub.f32 %v1173_v6, %v500_v29  ;;  %446 = vmatpush.msrb.mxu2 %v1152_v18 }
  0x3b   :  { %388 = vmatpush.msrb.mxu1 %v940_v5  ;;  %341 = vmatpush.msrb.mxu0 %v158_v41  ;;  %v483_v5 = vsub.f32 %v1162_v27, %v482_v25  ;;  %v489_v28 = vsub.f32 %v1165_v59, %v488_v39  ;;  %v1202_v41 = vsub.f32 %v432_v3, %v1170_v62 }
  0x3c   :  { %448 = vmatpush.msrb.mxu2 %v1154_v26 }
  0x3d   :  { %390 = vmatpush.msrb.mxu1 %v942_v9  ;;  %345 = vmatpush.msrb.mxu0 %v164_v48  ;;  %v506_v9 = vand.u32 4294901760, %v1177_v4  ;;  %v429_v48 = vld [vmem:[#allocation6 + $0x30] sm:$0xff]  ;;  %v484_v38 = vand.u32 4294901760, %v483_v5  ;;  %v490_v22 = vand.u32 4294901760, %v489_v28  ;;  %v502_v5 = vand.u32 4294901760, %v501_v47 }
  0x3e   :  { %v513_v28 = vsub.f32 %v1190_v30, %v512_v24  ;;  %450 = vmatpush.msrb.mxu2 %v1156_v55 }
  0x3f   :  { %392 = vmatpush.msrb.mxu1 %v944_v10  ;;  %349 = vmatpush.msrb.mxu0 %v170_v57  ;;  %v518_v10 = vand.u32 4294901760, %v1202_v41  ;;  %v1226_v57 = vand.u32 4294901760, %v429_v48  ;;  %v507_v3 = vsub.f32 %v1177_v4, %v506_v9 }
  0x40   :  { %485 = vmatpush.msrb.mxu3 %v484_v38  ;;  %v530_v38 = vand.u32 4294901760, %v1239_v51  ;;  %452 = vmatpush.msrb.mxu2 %v1170_v62 }
  0x41   :  { %394 = vmatpush.msrb.mxu1 %v946_v11  ;;  %353 = vmatpush.msrb.mxu0 %v176_v63  ;;  %v524_v11 = vand.u32 4294901760, %v1213_v43  ;;  %v426_v63 = vld [vmem:[#allocation6 + $0x18] sm:$0xff]  ;;  %v1246_v37 = vsub.f32 %v429_v48, %v1226_v57  ;;  %v519_v58 = vsub.f32 %v1202_v41, %v518_v10  ;;  %v508_v33 = vand.u32 4294901760, %v507_v3 }
  0x42   :  { %491 = vmatpush.msrb.mxu3 %v490_v22  ;;  %v1259_v48 = vsub.f32 %v428_v14, %v1232_v19  ;;  %v1261_v22 = vand.u32 4294901760, %v426_v63  ;;  %454 = vmatpush.msrb.mxu2 %v1185_v13 }
  0x43   :  { %396 = vmatpush.msrb.mxu1 %v958_v17  ;;  %357 = vmatpush.msrb.mxu0 %v182_v8  ;;  %v1248_v17 = vand.u32 4294901760, %v427_v42  ;;  %v425_v8 = vld [vmem:[#allocation6 + $0x10] sm:$0xff]  ;;  %v536_v47 = vand.u32 4294901760, %v1246_v37 }
  0x44   :  { %497 = vmatpush.msrb.mxu3 %v496_v53  ;;  %v1274_v53 = vand.u32 4294901760, %v425_v8  ;;  %v542_v3 = vand.u32 4294901760, %v1259_v48  ;;  %456 = vmatpush.msrb.mxu2 %v1224_v45 }
  0x45   :  { %398 = vmatpush.msrb.mxu1 %v967_v20  ;;  %361 = vmatpush.msrb.mxu0 %v188_v31  ;;  %v525_v20 = vsub.f32 %v1213_v43, %v524_v11  ;;  %v514_v31 = vand.u32 4294901760, %v513_v28  ;;  %v1272_v14 = vsub.f32 %v427_v42, %v1248_v17  ;;  %v1285_v42 = vsub.f32 %v426_v63, %v1261_v22 }
  0x46   :  { %503 = vmatpush.msrb.mxu3 %v502_v5  ;;  %v1287_v5 = vand.u32 4294901760, %v424_v0  ;;  %v537_v21 = vsub.f32 %v1246_v37, %v536_v47  ;;  %458 = vmatpush.msrb.mxu2 %v1226_v57  ;;  %v1298_v63 = vsub.f32 %v425_v8, %v1274_v53  ;;  %v1300_v28 = vand.u32 4294901760, %v423_v1 }
  0x47   :  { %400 = vmatpush.msrb.mxu1 %v993_v32  ;;  %365 = vmatpush.msrb.mxu0 %v194_v36  ;;  %v520_v32 = vand.u32 4294901760, %v519_v58  ;;  %v531_v36 = vsub.f32 %v1239_v51, %v530_v38  ;;  %v543_v40 = vsub.f32 %v1259_v48, %v542_v3 }
  0x48   :  { %509 = vmatpush.msrb.mxu3 %v508_v33  ;;  %v1311_v58 = vsub.f32 %v424_v0, %v1287_v5  ;;  %460 = vmatpush.msrb.mxu2 %v1232_v19  ;;  %v1321_v8 = vsub.f32 %v423_v1, %v1300_v28 }
  0x49   :  { %402 = vmatpush.msrb.mxu1 %v1012_v44  ;;  %369 = vmatpush.msrb.mxu0 %v200_v49  ;;  %v526_v44 = vand.u32 4294901760, %v525_v20  ;;  %v548_v49 = vand.u32 4294901760, %v1272_v14 }
  0x4a   :  { %515 = vmatpush.msrb.mxu3 %v514_v31  ;;  %v566_v20 = vand.u32 4294901760, %v1311_v58  ;;  %462 = vmatpush.msrb.mxu2 %v1248_v17  ;;  %v572_v31 = vand.u32 4294901760, %v1321_v8 }
  0x4b   :  { %404 = vmatpush.msrb.mxu1 %v1017_v46  ;;  %373 = vmatpush.msrb.mxu0 %v206_v56  ;;  %v532_v46 = vand.u32 4294901760, %v531_v36  ;;  %v554_v56 = vand.u32 4294901760, %v1285_v42  ;;  %v549_v50 = vsub.f32 %v1272_v14, %v548_v49 }
  0x4c   :  { %521 = vmatpush.msrb.mxu3 %v520_v32  ;;  %464 = vmatpush.msrb.mxu2 %v1261_v22  ;;  %v567_v32 = vsub.f32 %v1311_v58, %v566_v20 }
  0x4d   :  { %406 = vmatpush.msrb.mxu1 %v1029_v52  ;;  %377 = vmatpush.msrb.mxu0 %v212_v2  ;;  %v538_v52 = vand.u32 4294901760, %v537_v21  ;;  %v560_v2 = vand.u32 4294901760, %v1298_v63  ;;  %v555_v33 = vsub.f32 %v1285_v42, %v554_v56  ;;  %v550_v0 = vand.u32 4294901760, %v549_v50 }
  0x4e   :  { %379 = vmatmul.f32.vlgmr.msrb.gmra.mxu0 %v1082_v35  ;;  %527 = vmatpush.msrb.mxu3 %v526_v44 }
  0x4f   :  { %408 = vmatpush.msrb.mxu1 %v1031_v54  ;;  %583 = vmatpush.msra.mxu0 %v1162_v27  ;;  %v544_v54 = vand.u32 4294901760, %v543_v40 }
  0x50   :  { %533 = vmatpush.msrb.mxu3 %v532_v46  ;;  %466 = vmatpush.msrb.mxu2 %v1274_v53 }
  0x51   :  { %410 = vmatpush.msrb.mxu1 %v1046_v60  ;;  %586 = vmatpush.msra.mxu0 %v1165_v59  ;;  %v561_v60 = vsub.f32 %v1298_v63, %v560_v2 }
  0x52   :  { %539 = vmatpush.msrb.mxu3 %v538_v52  ;;  %468 = vmatpush.msrb.mxu2 %v1287_v5 }
  0x53   :  { %412 = vmatpush.msrb.mxu1 %v1065_v12  ;;  %589 = vmatpush.msra.mxu0 %v1168_v61  ;;  %v556_v12 = vand.u32 4294901760, %v555_v33  ;;  %v562_v1 = vand.u32 4294901760, %v561_v60 }
  0x54   :  { %545 = vmatpush.msrb.mxu3 %v544_v54  ;;  %470 = vmatpush.msrb.mxu2 %v1300_v28 }
  0x55   :  { %414 = vmatpush.msrb.mxu1 %v1080_v34  ;;  %592 = vmatpush.msra.mxu0 %v1173_v6  ;;  %v573_v34 = vsub.f32 %v1321_v8, %v572_v31 }
  0x56   :  { %416 = vmatmul.f32.vlgmr.msrb.gmra.mxu1 %v1082_v35  ;;  %551 = vmatpush.msrb.mxu3 %v550_v0  ;;  %v568_v35 = vand.u32 4294901760, %v567_v32 }
  0x57   :  { %636 = vmatpush.msra.mxu1 %v1145_v15  ;;  %595 = vmatpush.msra.mxu0 %v1177_v4  ;;  %v574_v36 = vand.u32 4294901760, %v573_v34 }
  0x58   :  { %557 = vmatpush.msrb.mxu3 %v556_v12  ;;  %677 = vmatpush.msra.mxu2 %v482_v25 }
  0x59   :  { %638 = vmatpush.msra.mxu1 %v1147_v23  ;;  %598 = vmatpush.msra.mxu0 %v1190_v30 }
  0x5a   :  { %563 = vmatpush.msrb.mxu3 %v562_v1  ;;  %681 = vmatpush.msra.mxu2 %v488_v39 }
  0x5b   :  { %640 = vmatpush.msra.mxu1 %v1149_v16  ;;  %601 = vmatpush.msra.mxu0 %v1202_v41 }
  0x5c   :  { %569 = vmatpush.msrb.mxu3 %v568_v35  ;;  %685 = vmatpush.msra.mxu2 %v494_v7 }
  0x5d   :  { %642 = vmatpush.msra.mxu1 %v1152_v18  ;;  %604 = vmatpush.msra.mxu0 %v1213_v43 }
  0x5e   :  { %575 = vmatpush.msrb.mxu3 %v574_v36  ;;  %689 = vmatpush.msra.mxu2 %v500_v29 }
  0x5f   :  { %644 = vmatpush.msra.mxu1 %v1154_v26  ;;  %607 = vmatpush.msra.mxu0 %v1239_v51 }
  0x60   :  { %744 = vmatpush.msra.mxu3 %v1145_v15  ;;  %693 = vmatpush.msra.mxu2 %v506_v9  ;;  %v815_v15 = vld [vmem:[%s1436_s2] ss:$0 sm:$0xff] }
  0x61   :  { %646 = vmatpush.msra.mxu1 %v1156_v55  ;;  %610 = vmatpush.msra.mxu0 %v1246_v37 }
  0x62   :  { %746 = vmatpush.msra.mxu3 %v1147_v23  ;;  %697 = vmatpush.msra.mxu2 %v512_v24 }
  0x63   :  { %648 = vmatpush.msra.mxu1 %v1170_v62  ;;  %613 = vmatpush.msra.mxu0 %v1259_v48 }
  0x64   :  { %748 = vmatpush.msra.mxu3 %v1149_v16  ;;  %701 = vmatpush.msra.mxu2 %v518_v10 }
  0x65   :  { %650 = vmatpush.msra.mxu1 %v1185_v13  ;;  %616 = vmatpush.msra.mxu0 %v1272_v14 }
  0x66   :  { %750 = vmatpush.msra.mxu3 %v1152_v18  ;;  %705 = vmatpush.msra.mxu2 %v524_v11 }
  0x67   :  { %652 = vmatpush.msra.mxu1 %v1224_v45  ;;  %619 = vmatpush.msra.mxu0 %v1285_v42 }
  0x68   :  { %752 = vmatpush.msra.mxu3 %v1154_v26  ;;  %709 = vmatpush.msra.mxu2 %v530_v38 }
  0x69   :  { %654 = vmatpush.msra.mxu1 %v1226_v57  ;;  %622 = vmatpush.msra.mxu0 %v1298_v63 }
  0x6a   :  { %754 = vmatpush.msra.mxu3 %v1156_v55  ;;  %713 = vmatpush.msra.mxu2 %v536_v47 }
  0x6b   :  { %656 = vmatpush.msra.mxu1 %v1232_v19  ;;  %625 = vmatpush.msra.mxu0 %v1311_v58 }
  0x6c   :  { %756 = vmatpush.msra.mxu3 %v1170_v62  ;;  %717 = vmatpush.msra.mxu2 %v542_v3 }
  0x6d   :  { %658 = vmatpush.msra.mxu1 %v1248_v17  ;;  %628 = vmatpush.msra.mxu0 %v1321_v8 }
  0x6e   :  { %758 = vmatpush.msra.mxu3 %v1185_v13  ;;  %721 = vmatpush.msra.mxu2 %v548_v49 }
  0x6f   :  { %660 = vmatpush.msra.mxu1 %v1261_v22 }
  0x70   :  { %760 = vmatpush.msra.mxu3 %v1224_v45  ;;  %725 = vmatpush.msra.mxu2 %v554_v56 }
  0x71   :  { %662 = vmatpush.msra.mxu1 %v1274_v53 }
  0x72   :  { %762 = vmatpush.msra.mxu3 %v1226_v57  ;;  %729 = vmatpush.msra.mxu2 %v560_v2 }
  0x73   :  { %664 = vmatpush.msra.mxu1 %v1287_v5 }
  0x74   :  { %764 = vmatpush.msra.mxu3 %v1232_v19  ;;  %733 = vmatpush.msra.mxu2 %v566_v20 }
  0x75   :  { %666 = vmatpush.msra.mxu1 %v1300_v28 }
  0x76   :  { %766 = vmatpush.msra.mxu3 %v1248_v17  ;;  %737 = vmatpush.msra.mxu2 %v572_v31  ;;  %v816_v17 = vld [vmem:[%s1438_s4] ss:$0 sm:$0xff] }
  0x78   :  { %768 = vmatpush.msra.mxu3 %v1261_v22 }
  0x7a   :  { %770 = vmatpush.msra.mxu3 %v1274_v53 }
  0x7c   :  { %772 = vmatpush.msra.mxu3 %v1287_v5 }
  0x7e   :  { %774 = vmatpush.msra.mxu3 %v1300_v28 }
  0xaf   :  { %v117_v23 = vpop.f32.mrf.mxu0 }
  0xb0   :  { %v118_v16 = vadd.f32 %v815_v15, %v117_v23 }
  0xb3   :  { %v218_v18 = vpop.f32.mrf.mxu1  ;;  %v311_v59 = vpop.f32.mrf.mxu3 }
  0xb4   :  { %v219_v26 = vadd.f32 %v218_v18, %v118_v16 }
  0xb5   :  { %v272_v55 = vpop.f32.mrf.mxu2 }
  0xb6   :  { %v273_v27 = vadd.f32 %v272_v55, %v219_v26 }
  0xb8   :  { %v312_v61 = vadd.f32 %v311_v59, %v273_v27 }
  0xcb   :  { %v380_v62 = vpop.f32.mrf.mxu0 }
  0xcc   :  { %v381_v6 = vadd.f32 %v380_v62, %v312_v61 }
  0xd3   :  { %v417_v4 = vpop.f32.mrf.mxu1 }
  0xd4   :  { %v418_v25 = vadd.f32 %v417_v4, %v381_v6 }
  0xd6   :  { %v420_v39 = vmul.f32 0.01, %v418_v25 }
  0xd8   :  { %v421_v7 = vmax.f32 %v418_v25, %v420_v39 }
  0xda   :  { %v471_v13 = vand.u32 4294901760, %v421_v7 }
  0xdc   :  { %v472_v29 = vsub.f32 %v421_v7, %v471_v13  ;;  %577 = vmatmul.f32.vlgmr.msrb.gmra.mxu3 %v471_v13 }
  0xde   :  { %631 = vmatmul.f32.vlgmr.msra.gmra.mxu0 %v472_v29  ;;  %v473_v30 = vand.u32 4294901760, %v472_v29 }
  0xe0   :  { %670 = vmatmul.f32.vlgmr.msra.gmra.mxu1 %v473_v30  ;;  %v474_v41 = vsub.f32 %v472_v29, %v473_v30 }
  0xe2   :  { %v475_v9 = vand.u32 4294901760, %v474_v41 }
  0xe4   :  { %476 = vmatmul.f32.vlgmr.msrb.gmra.mxu2 %v475_v9  ;;  %776 = vmatmul.f32.vlgmr.msra.gmra.mxu3 %v471_v13 }
  0xec   :  { %739 = vmatmul.f32.vlgmr.msra.gmra.mxu2 %v471_v13 }
 0x15b   :  { %v632_v45 = vpop.f32.mrf.mxu0 }
 0x15d   :  { %v671_v19 = vpop.f32.mrf.mxu1 }
 0x15f   :  { %v578_v43 = vpop.f32.mrf.mxu3 }
 0x167   :  { %v477_v24 = vpop.f32.mrf.mxu2  ;;  %v777_v38 = vpop.f32.mrf.mxu3 }
 0x168   :  { %v579_v10 = vadd.f32 %v578_v43, %v477_v24 }
 0x16a   :  { %v633_v57 = vadd.f32 %v632_v45, %v579_v10 }
 0x16c   :  { %v672_v11 = vadd.f32 %v671_v19, %v633_v57 }
 0x16f   :  { %v740_v51 = vpop.f32.mrf.mxu2 }
 0x170   :  { %v741_v37 = vadd.f32 %v740_v51, %v672_v11 }
 0x172   :  { %v778_v48 = vadd.f32 %v777_v38, %v741_v37 }
 0x174   :  { %v790_v22 = vadd.f32 %v816_v17, %v778_v48 }
 0x176   :  { %791 = vst [vmem:[#allocation8] sm:$0xff] %v790_v22 }
 0x177   :  { %802 = dma.vmem_to_hbm [thread:$0]  %s798_s8, 128, %s800_s11, [#allocation5]  }
 0x178   :  { %893 = dma.done.wait [#allocation5], 128  }
 0x179   :  { %894 = vsyncadd [#allocation5], 4294967168 }
 0x17a   :  { %807 = vsyncpa [#allocation4], 1 }
 0x17b   :  { %808 = vsyncpa [#allocation7], 1 }
 0x17c   :  { %809 = vsyncpa [#allocation5], 1 }

</bundles_post_ra>
